<compile_context>
chip_gen: v7x
topology: tpu7x:2x2x1
jax: 0.10.0
libtpu: 0.0.40
codegen_flags: <defaults>
</compile_context>

<pallas_src>
import numpy as np
import jax
import jax.numpy as jnp
from jax.experimental import pallas as pl
from jax.experimental.pallas import tpu as pltpu


def make_attention_kernel(num_heads: int, dim: int, batch_tile: int,
                          seq_len: int):
    H, C = num_heads, dim
    Dh = C // H
    Bt, N = batch_tile, seq_len
    M = Bt * N

    def kernel(x_ref, mask_ref, wqkv_ref, wproj_ref, bproj_ref, coef_ref,
               out_ref, attn_ref, emask_ref, acc_ref):
        h = pl.program_id(1)

        # ---- once per batch tile: expanded pad-mask + output accumulator ---
        @pl.when(h == 0)
        def _init():
            m = mask_ref[...]                                    # (Bt, N)
            emask_ref[...] = m[:, :, None] * m[:, None, :]       # (Bt, N, N)
            acc_ref[...] = jnp.zeros_like(acc_ref)

        # ---- this head's QKV projection: bf16 MXU, f32 accumulation --------
        x2d = x_ref[...].reshape(M, C).astype(jnp.bfloat16)      # (M, C)
        qkv = jnp.dot(x2d, wqkv_ref[0],
                      preferred_element_type=jnp.float32)        # (M, 3*Dh) f32

        # fold `* scale / temperature` into Q once (coef precomputed on host)
        q = (qkv[:, 0:Dh] * coef_ref[0]).reshape(Bt, N, Dh).astype(jnp.bfloat16)
        k = qkv[:, Dh:2 * Dh].reshape(Bt, N, Dh).astype(jnp.bfloat16)
        v = qkv[:, 2 * Dh:3 * Dh].reshape(Bt, N, Dh).astype(jnp.bfloat16)

        # ---- scores + masked softmax (softmax math kept in f32) ------------
        s = jnp.einsum('bnd,bmd->bnm', q, k,
                       preferred_element_type=jnp.float32)       # (Bt, N, N)
        emask = emask_ref[...]
        s = jnp.where(emask > 0.0, s, jnp.float32(-1e30))
        s_max = jnp.max(s, axis=-1, keepdims=True)
        e = jnp.exp(s - s_max) * emask          # masked columns -> exactly 0
        denom = jnp.sum(e, axis=-1, keepdims=True)
        inv = pl.reciprocal(jnp.where(denom == 0.0, jnp.float32(1.0), denom),
                            approx=True)        # EUP, not a full-tile divide
        p = e * inv                                              # (Bt, N, N)
        attn_ref[...] = p.reshape(Bt, 1, N, N).astype(attn_ref.dtype)

        # ---- context + partial output projection (lane-dense accumulate) ---
        ctx = jnp.einsum('bnm,bmd->bnd', p.astype(jnp.bfloat16), v,
                         preferred_element_type=jnp.float32)     # (Bt, N, Dh)
        acc_ref[...] += jnp.dot(ctx.reshape(M, Dh).astype(jnp.bfloat16),
                                wproj_ref[0],
                                preferred_element_type=jnp.float32)   # (M, C)

        # ---- last head: add bias and emit the projected output -------------
        @pl.when(h == H - 1)
        def _finalize():
            out = acc_ref[...] + bproj_ref[...]
            out_ref[...] = out.reshape(Bt, N, C).astype(out_ref.dtype)

    return kernel


def _pick_batch_tile(batch: int, seq: int, target_rows: int = 256) -> int:
    """Smallest divisor of `batch` giving >= target_rows matmul rows, else all."""
    for bt in range(1, batch + 1):
        if batch % bt == 0 and bt * seq >= target_rows:
            return bt
    return batch


def attention_pallas(x, pad_mask, w_qkv, w_proj, b_proj, temperature,
                     num_heads, attn_dtype=jnp.float32):
    """x: (B, N, C) f32; pad_mask: (B, N, 1) f32 of {0,1};
    w_qkv: (3C, C) torch layout; w_proj: (C, C) torch layout; b_proj: (C,)."""
    B, N, C = x.shape
    H = num_heads
    Dh = C // H
    scale = Dh ** (-0.5)

    Bt = _pick_batch_tile(B, N)
    grid = (B // Bt, H)

    # glue: torch Linear computes x @ W.T + b -> transpose, then split per head.
    w_qkv_t = jnp.asarray(w_qkv, jnp.float32).T                   # (C, 3C)
    # columns of x@W_qkv^T are ordered (which, head, dh); regroup per head so
    # head h's block is [q_h | k_h | v_h] of width 3*Dh.
    wqkv_heads = (w_qkv_t.reshape(C, 3, H, Dh)
                  .transpose(2, 0, 1, 3)
                  .reshape(H, C, 3 * Dh)
                  .astype(jnp.bfloat16))                          # (H, C, 3Dh)
    wproj_heads = (jnp.asarray(w_proj, jnp.float32).T
                   .reshape(H, Dh, C)
                   .astype(jnp.bfloat16))                         # (H, Dh, C)
    b_proj2d = jnp.asarray(b_proj, jnp.float32).reshape(1, C)

    mask_flat = jnp.asarray(pad_mask, jnp.float32).reshape(B, N)  # lane-dense
    coef = (jnp.float32(scale)
            / jnp.asarray(temperature, jnp.float32)).reshape(1)   # SMEM scalar

    kernel = make_attention_kernel(H, C, Bt, N)

    out_x, attn = pl.pallas_call(
        kernel,
        grid=grid,
        in_specs=[
            pl.BlockSpec((Bt, N, C), lambda b, h: (b, 0, 0)),         # x
            pl.BlockSpec((Bt, N), lambda b, h: (b, 0)),               # pad mask
            pl.BlockSpec((1, C, 3 * Dh), lambda b, h: (h, 0, 0)),     # Wqkv[h]
            pl.BlockSpec((1, Dh, C), lambda b, h: (h, 0, 0)),         # Wproj[h]
            pl.BlockSpec((1, C), lambda b, h: (0, 0),
                         pipeline_mode=pl.Buffered(1)),               # b_proj
            pl.BlockSpec(memory_space=pltpu.SMEM),                    # scale/temp
        ],
        out_specs=[
            pl.BlockSpec((Bt, N, C), lambda b, h: (b, 0, 0)),         # x out
            pl.BlockSpec((Bt, 1, N, N), lambda b, h: (b, h, 0, 0)),   # attn out
        ],
        out_shape=(
            jax.ShapeDtypeStruct((B, N, C), jnp.float32),
            jax.ShapeDtypeStruct((B, H, N, N), attn_dtype),
        ),
        scratch_shapes=[
            pltpu.VMEM((Bt, N, N), jnp.float32),        # expanded pad mask
            pltpu.VMEM((Bt * N, C), jnp.float32),       # out-proj accumulator
        ],
        compiler_params=pltpu.CompilerParams(
            dimension_semantics=("parallel", "arbitrary")),
    )(x.astype(jnp.float32), mask_flat, wqkv_heads, wproj_heads,
      b_proj2d, coef)
    return out_x, attn


def attention_reference(x, pad_mask, w_qkv, w_proj, b_proj, temperature,
                        num_heads):
    """Pure-JAX (f32) replica of the PyTorch forward for correctness checking."""
    B, N, C = x.shape
    H = num_heads
    Dh = C // H
    qkv = x @ w_qkv.T                                        # (B, N, 3C)
    qkv = qkv.reshape(B, N, 3, H, Dh).transpose(2, 0, 3, 1, 4)
    q, k, v = qkv[0], qkv[1], qkv[2]                         # (B, H, N, Dh)
    attn = jnp.einsum('bhnd,bhmd->bhnm', q, k) * (Dh ** -0.5) / temperature
    m = pad_mask[:, :, 0]                                    # (B, N)
    em = m[:, None, :, None] * m[:, None, None, :]           # (B, 1, N, N)
    attn = jnp.where(em == 0.0, -jnp.inf, attn)
    a_max = jnp.max(attn, axis=-1, keepdims=True)
    e = jnp.exp(attn - a_max)
    attn = e / jnp.sum(e, axis=-1, keepdims=True)
    attn = jnp.nan_to_num(attn)
    out = jnp.einsum('bhnm,bhmd->bhnd', attn, v)
    out = out.transpose(0, 2, 1, 3).reshape(B, N, C)
    out = out @ w_proj.T + b_proj
    return out, attn


if __name__ == "__main__":
    # Small shapes consistent with the module: B=2 batches, N=8 tokens,
    # dim=32 channels, num_heads=4 (head_dim=8).
    B, N, C, H = 2, 8, 32, 4
    temperature = 2.0

    key = jax.random.PRNGKey(0)
    kx, kq, kp, kb = jax.random.split(key, 4)

    x = jax.random.normal(kx, (B, N, C), dtype=jnp.float32)
    # deterministic synthetic parameters (torch layouts: (out, in))
    w_qkv = 0.02 * jax.random.normal(kq, (3 * C, C), dtype=jnp.float32)
    w_proj = 0.02 * jax.random.normal(kp, (C, C), dtype=jnp.float32)
    b_proj = 0.01 * jax.random.normal(kb, (C,), dtype=jnp.float32)

    # pad_mask (B, N, 1): batch 0 fully valid, batch 1 has last 3 tokens padded
    pad_mask = np.ones((B, N, 1), dtype=np.float32)
    pad_mask[1, -3:, 0] = 0.0
    pad_mask = jnp.asarray(pad_mask)

    out_x, attn = attention_pallas(x, pad_mask, w_qkv, w_proj, b_proj,
                                   temperature, H)
    jax.block_until_ready((out_x, attn))

    ref_x, ref_attn = attention_reference(x, pad_mask, w_qkv, w_proj, b_proj,
                                          temperature, H)
    # bf16 MXU operands + approx reciprocal -> relaxed tolerance vs f32 ref.
    assert np.allclose(np.asarray(out_x), np.asarray(ref_x),
                       atol=2e-2, rtol=2e-2)
    assert np.allclose(np.asarray(attn), np.asarray(ref_attn),
                       atol=2e-2, rtol=2e-2)

    print("KERNEL_OK")
</pallas_src>

<mosaic_0001>
module attributes {stable_mosaic.version = 11 : i64} {
  func.func @kernel(%arg0: i32, %arg1: i32, %arg2: memref<2x8x32xf32, #tpu.memory_space<vmem>>, %arg3: memref<2x8xf32, #tpu.memory_space<vmem>>, %arg4: memref<1x32x24xbf16, #tpu.memory_space<vmem>>, %arg5: memref<1x8x32xbf16, #tpu.memory_space<vmem>>, %arg6: memref<1x32xf32, #tpu.memory_space<vmem>>, %arg7: memref<1xf32, #tpu.memory_space<smem>>, %arg8: memref<2x8x32xf32, #tpu.memory_space<vmem>>, %arg9: memref<2x1x8x8xf32, #tpu.memory_space<vmem>>, %arg10: memref<2x8x8xf32, #tpu.memory_space<vmem>>, %arg11: memref<16x32xf32, #tpu.memory_space<vmem>>) attributes {dimension_semantics = [#tpu.dimension_semantics<parallel>, #tpu.dimension_semantics<arbitrary>], iteration_bounds = array<i64: 1, 4>, scalar_prefetch = 0 : i64, scratch_operands = 2 : i64, tpu.core_type = #tpu.core_type<tc>, window_params = [{transform_indices = @transform_0, window_bounds = array<i64: 2, 8, 32>}, {transform_indices = @transform_1, window_bounds = array<i64: 2, 8>}, {transform_indices = @transform_2, window_bounds = array<i64: 1, 32, 24>}, {transform_indices = @transform_3, window_bounds = array<i64: 1, 8, 32>}, {pipeline_mode = #tpu.pipeline_mode<synchronous>, transform_indices = @transform_4, window_bounds = array<i64: 1, 32>}, {transform_indices = @transform_5, window_bounds = array<i64: 1>}, {transform_indices = @transform_6, window_bounds = array<i64: 2, 8, 32>}, {transform_indices = @transform_7, window_bounds = array<i64: 2, 1, 8, 8>}]} {
    %c0_i32 = arith.constant 0 : i32
    %0 = arith.cmpi eq, %arg1, %c0_i32 : i32
    %1 = arith.extui %0 : i1 to i32
    %c0_i32_0 = arith.constant 0 : i32
    %2 = arith.cmpi ne, %1, %c0_i32_0 : i32
    scf.if %2 {
      %c0_31 = arith.constant 0 : index
      %c0_32 = arith.constant 0 : index
      %57 = vector.load %arg3[%c0_31, %c0_32] : memref<2x8xf32, #tpu.memory_space<vmem>>, vector<2x8xf32>
      %58 = vector.shape_cast %57 : vector<2x8xf32> to vector<2x8x1xf32>
      %59 = vector.shape_cast %57 : vector<2x8xf32> to vector<2x1x8xf32>
      %60 = vector.broadcast %58 : vector<2x8x1xf32> to vector<2x8x8xf32>
      %61 = vector.broadcast %59 : vector<2x1x8xf32> to vector<2x8x8xf32>
      %62 = arith.mulf %60, %61 : vector<2x8x8xf32>
      %c0_33 = arith.constant 0 : index
      %c0_34 = arith.constant 0 : index
      %c0_35 = arith.constant 0 : index
      %63 = vector.load %arg10[%c0_33, %c0_34, %c0_35] : memref<2x8x8xf32, #tpu.memory_space<vmem>>, vector<2x8x8xf32>
      tpu.vector_store %arg10[%c0_33, %c0_34, %c0_35], %62 {strides = array<i32>} : memref<2x8x8xf32, #tpu.memory_space<vmem>>, vector<2x8x8xf32>,
      %cst_36 = arith.constant 0.000000e+00 : f32
      %64 = vector.broadcast %cst_36 : f32 to vector<16x32xf32>
      %c0_37 = arith.constant 0 : index
      %c0_38 = arith.constant 0 : index
      %65 = vector.load %arg11[%c0_37, %c0_38] : memref<16x32xf32, #tpu.memory_space<vmem>>, vector<16x32xf32>
      tpu.vector_store %arg11[%c0_37, %c0_38], %64 {strides = array<i32>} : memref<16x32xf32, #tpu.memory_space<vmem>>, vector<16x32xf32>,
    } else {
    }
    %c0 = arith.constant 0 : index
    %c0_1 = arith.constant 0 : index
    %c0_2 = arith.constant 0 : index
    %3 = vector.load %arg2[%c0, %c0_1, %c0_2] : memref<2x8x32xf32, #tpu.memory_space<vmem>>, vector<2x8x32xf32>
    %4 = vector.shape_cast %3 : vector<2x8x32xf32> to vector<16x32xf32>
    %5 = arith.truncf %4 : vector<16x32xf32> to vector<16x32xbf16>
    %c0_3 = arith.constant 0 : index
    %c0_4 = arith.constant 0 : index
    %c0_5 = arith.constant 0 : index
    %6 = vector.load %arg4[%c0_3, %c0_4, %c0_5] : memref<1x32x24xbf16, #tpu.memory_space<vmem>>, vector<1x32x24xbf16>
    %7 = vector.shape_cast %6 : vector<1x32x24xbf16> to vector<32x24xbf16>
    %cst = arith.constant dense<0.000000e+00> : vector<16x24xf32>
    %8 = tpu.matmul %5, %7, %cst {dimension_numbers = #tpu.dot_dimension_numbers<[1], [0], [0], [1], [0, 0, 1, 1], [], []>} : vector<16x32xbf16>, vector<32x24xbf16>, vector<16x24xf32> -> vector<16x24xf32>
    %9 = vector.extract_strided_slice %8 {offsets = [0, 0], sizes = [16, 8], strides = [1, 1]} : vector<16x24xf32> to vector<16x8xf32>
    %c0_6 = arith.constant 0 : index
    %10 = memref.load %arg7[%c0_6] : memref<1xf32, #tpu.memory_space<smem>>
    %11 = vector.broadcast %10 : f32 to vector<16x8xf32>
    %12 = arith.mulf %9, %11 : vector<16x8xf32>
    %13 = vector.shape_cast %12 : vector<16x8xf32> to vector<2x8x8xf32>
    %14 = arith.truncf %13 : vector<2x8x8xf32> to vector<2x8x8xbf16>
    %15 = vector.extract_strided_slice %8 {offsets = [0, 8], sizes = [16, 8], strides = [1, 1]} : vector<16x24xf32> to vector<16x8xf32>
    %16 = vector.shape_cast %15 : vector<16x8xf32> to vector<2x8x8xf32>
    %17 = arith.truncf %16 : vector<2x8x8xf32> to vector<2x8x8xbf16>
    %18 = vector.extract_strided_slice %8 {offsets = [0, 16], sizes = [16, 8], strides = [1, 1]} : vector<16x24xf32> to vector<16x8xf32>
    %19 = vector.shape_cast %18 : vector<16x8xf32> to vector<2x8x8xf32>
    %20 = arith.truncf %19 : vector<2x8x8xf32> to vector<2x8x8xbf16>
    "tpu.trace_start"() <{level = 10 : i32, message = "bnd,bmd->bnm"}> : () -> ()
    %cst_7 = arith.constant dense<0.000000e+00> : vector<2x8x8xf32>
    %21 = tpu.matmul %14, %17, %cst_7 {dimension_numbers = #tpu.dot_dimension_numbers<[2], [2], [1], [1], [0, 0, 0, 1, 1, 1], [0], [0]>} : vector<2x8x8xbf16>, vector<2x8x8xbf16>, vector<2x8x8xf32> -> vector<2x8x8xf32>
    "tpu.trace_stop"() : () -> ()
    %c0_8 = arith.constant 0 : index
    %c0_9 = arith.constant 0 : index
    %c0_10 = arith.constant 0 : index
    %22 = vector.load %arg10[%c0_8, %c0_9, %c0_10] : memref<2x8x8xf32, #tpu.memory_space<vmem>>, vector<2x8x8xf32>
    %cst_11 = arith.constant 0.000000e+00 : f32
    %23 = vector.broadcast %cst_11 : f32 to vector<2x8x8xf32>
    %24 = arith.cmpf ogt, %22, %23 : vector<2x8x8xf32>
    %cst_12 = arith.constant -1.000000e+30 : f32
    %25 = vector.broadcast %cst_12 : f32 to vector<2x8x8xf32>
    %26 = arith.select %24, %21, %25 : vector<2x8x8xi1>, vector<2x8x8xf32>
    %cst_13 = arith.constant dense<0xFF800000> : vector<2x8xf32>
    %27 = vector.multi_reduction <maximumf>, %26, %cst_13 [2] : vector<2x8x8xf32> to vector<2x8xf32>
    %28 = vector.shape_cast %27 : vector<2x8xf32> to vector<2x8x1xf32>
    %29 = vector.broadcast %28 : vector<2x8x1xf32> to vector<2x8x8xf32>
    %30 = arith.subf %26, %29 : vector<2x8x8xf32>
    %31 = math.exp %30 : vector<2x8x8xf32>
    %32 = arith.mulf %31, %22 : vector<2x8x8xf32>
    %cst_14 = arith.constant dense<0.000000e+00> : vector<2x8xf32>
    %33 = vector.multi_reduction <add>, %32, %cst_14 [2] : vector<2x8x8xf32> to vector<2x8xf32>
    %34 = vector.shape_cast %33 : vector<2x8xf32> to vector<2x8x1xf32>
    %cst_15 = arith.constant 0.000000e+00 : f32
    %35 = vector.broadcast %cst_15 : f32 to vector<2x8x1xf32>
    %36 = arith.cmpf oeq, %34, %35 : vector<2x8x1xf32>
    %cst_16 = arith.constant 1.000000e+00 : f32
    %37 = vector.broadcast %cst_16 : f32 to vector<2x8x1xf32>
    %38 = arith.select %36, %37, %34 : vector<2x8x1xi1>, vector<2x8x1xf32>
    %39 = tpu.reciprocal %38 {approx = true} : vector<2x8x1xf32> -> vector<2x8x1xf32>
    %40 = vector.broadcast %39 : vector<2x8x1xf32> to vector<2x8x8xf32>
    %41 = arith.mulf %32, %40 : vector<2x8x8xf32>
    %42 = vector.shape_cast %41 : vector<2x8x8xf32> to vector<2x1x8x8xf32>
    %c0_17 = arith.constant 0 : index
    %c0_18 = arith.constant 0 : index
    %c0_19 = arith.constant 0 : index
    %c0_20 = arith.constant 0 : index
    %43 = vector.load %arg9[%c0_17, %c0_18, %c0_19, %c0_20] : memref<2x1x8x8xf32, #tpu.memory_space<vmem>>, vector<2x1x8x8xf32>
    tpu.vector_store %arg9[%c0_17, %c0_18, %c0_19, %c0_20], %42 {strides = array<i32>} : memref<2x1x8x8xf32, #tpu.memory_space<vmem>>, vector<2x1x8x8xf32>,
    %44 = arith.truncf %41 : vector<2x8x8xf32> to vector<2x8x8xbf16>
    "tpu.trace_start"() <{level = 10 : i32, message = "bnm,bmd->bnd"}> : () -> ()
    %cst_21 = arith.constant dense<0.000000e+00> : vector<2x8x8xf32>
    %45 = tpu.matmul %44, %20, %cst_21 {dimension_numbers = #tpu.dot_dimension_numbers<[2], [1], [1], [2], [0, 0, 0, 1, 1, 2], [0], [0]>} : vector<2x8x8xbf16>, vector<2x8x8xbf16>, vector<2x8x8xf32> -> vector<2x8x8xf32>
    "tpu.trace_stop"() : () -> ()
    %c0_22 = arith.constant 0 : index
    %c0_23 = arith.constant 0 : index
    %46 = vector.load %arg11[%c0_22, %c0_23] : memref<16x32xf32, #tpu.memory_space<vmem>>, vector<16x32xf32>
    %47 = vector.shape_cast %45 : vector<2x8x8xf32> to vector<16x8xf32>
    %48 = arith.truncf %47 : vector<16x8xf32> to vector<16x8xbf16>
    %c0_24 = arith.constant 0 : index
    %c0_25 = arith.constant 0 : index
    %c0_26 = arith.constant 0 : index
    %49 = vector.load %arg5[%c0_24, %c0_25, %c0_26] : memref<1x8x32xbf16, #tpu.memory_space<vmem>>, vector<1x8x32xbf16>
    %50 = vector.shape_cast %49 : vector<1x8x32xbf16> to vector<8x32xbf16>
    %cst_27 = arith.constant dense<0.000000e+00> : vector<16x32xf32>
    %51 = tpu.matmul %48, %50, %cst_27 {dimension_numbers = #tpu.dot_dimension_numbers<[1], [0], [0], [1], [0, 0, 1, 1], [], []>} : vector<16x8xbf16>, vector<8x32xbf16>, vector<16x32xf32> -> vector<16x32xf32>
    %52 = arith.addf %46, %51 : vector<16x32xf32>
    %c0_28 = arith.constant 0 : index
    %c0_29 = arith.constant 0 : index
    %53 = vector.load %arg11[%c0_28, %c0_29] : memref<16x32xf32, #tpu.memory_space<vmem>>, vector<16x32xf32>
    tpu.vector_store %arg11[%c0_28, %c0_29], %52 {strides = array<i32>} : memref<16x32xf32, #tpu.memory_space<vmem>>, vector<16x32xf32>,
    %c3_i32 = arith.constant 3 : i32
    %54 = arith.cmpi eq, %arg1, %c3_i32 : i32
    %55 = arith.extui %54 : i1 to i32
    %c0_i32_30 = arith.constant 0 : i32
    %56 = arith.cmpi ne, %55, %c0_i32_30 : i32
    scf.if %56 {
      %c0_31 = arith.constant 0 : index
      %c0_32 = arith.constant 0 : index
      %57 = vector.load %arg11[%c0_31, %c0_32] : memref<16x32xf32, #tpu.memory_space<vmem>>, vector<16x32xf32>
      %c0_33 = arith.constant 0 : index
      %c0_34 = arith.constant 0 : index
      %58 = vector.load %arg6[%c0_33, %c0_34] : memref<1x32xf32, #tpu.memory_space<vmem>>, vector<1x32xf32>
      %59 = vector.broadcast %58 : vector<1x32xf32> to vector<16x32xf32>
      %60 = arith.addf %57, %59 : vector<16x32xf32>
      %61 = vector.shape_cast %60 : vector<16x32xf32> to vector<2x8x32xf32>
      %c0_35 = arith.constant 0 : index
      %c0_36 = arith.constant 0 : index
      %c0_37 = arith.constant 0 : index
      %62 = vector.load %arg8[%c0_35, %c0_36, %c0_37] : memref<2x8x32xf32, #tpu.memory_space<vmem>>, vector<2x8x32xf32>
      tpu.vector_store %arg8[%c0_35, %c0_36, %c0_37], %61 {strides = array<i32>} : memref<2x8x32xf32, #tpu.memory_space<vmem>>, vector<2x8x32xf32>,
    } else {
    }
    return
  }
  func.func @transform_0(%arg0: i32, %arg1: i32) -> (i32, i32, i32) {
    %c0_i32 = arith.constant 0 : i32
    %c0_i32_0 = arith.constant 0 : i32
    %c0_i32_1 = arith.constant 0 : i32
    return %arg0, %c0_i32, %c0_i32_0 : i32, i32, i32
  }
  func.func @transform_1(%arg0: i32, %arg1: i32) -> (i32, i32) {
    %c0_i32 = arith.constant 0 : i32
    %c0_i32_0 = arith.constant 0 : i32
    return %arg0, %c0_i32 : i32, i32
  }
  func.func @transform_2(%arg0: i32, %arg1: i32) -> (i32, i32, i32) {
    %c0_i32 = arith.constant 0 : i32
    %c0_i32_0 = arith.constant 0 : i32
    %c0_i32_1 = arith.constant 0 : i32
    return %arg1, %c0_i32, %c0_i32_0 : i32, i32, i32
  }
  func.func @transform_3(%arg0: i32, %arg1: i32) -> (i32, i32, i32) {
    %c0_i32 = arith.constant 0 : i32
    %c0_i32_0 = arith.constant 0 : i32
    %c0_i32_1 = arith.constant 0 : i32
    return %arg1, %c0_i32, %c0_i32_0 : i32, i32, i32
  }
  func.func @transform_4(%arg0: i32, %arg1: i32) -> (i32, i32) {
    %c0_i32 = arith.constant 0 : i32
    %c0_i32_0 = arith.constant 0 : i32
    %c0_i32_1 = arith.constant 0 : i32
    return %c0_i32, %c0_i32_0 : i32, i32
  }
  func.func @transform_5(%arg0: i32, %arg1: i32) -> i32 {
    %c0_i32 = arith.constant 0 : i32
    %c0_i32_0 = arith.constant 0 : i32
    return %c0_i32 : i32
  }
  func.func @transform_6(%arg0: i32, %arg1: i32) -> (i32, i32, i32) {
    %c0_i32 = arith.constant 0 : i32
    %c0_i32_0 = arith.constant 0 : i32
    %c0_i32_1 = arith.constant 0 : i32
    return %arg0, %c0_i32, %c0_i32_0 : i32, i32, i32
  }
  func.func @transform_7(%arg0: i32, %arg1: i32) -> (i32, i32, i32, i32) {
    %c0_i32 = arith.constant 0 : i32
    %c0_i32_0 = arith.constant 0 : i32
    %c0_i32_1 = arith.constant 0 : i32
    return %arg0, %arg1, %c0_i32, %c0_i32_0 : i32, i32, i32, i32
  }
}

</mosaic_0001>

<bundles_post_ra>
// kernel: tpu_custom_call.1
= control target key start
LH: loop header
LB: loop body
LE: loop exit
PB: predicated region body
PF: predicated region fallthrough
CT: control target
= control target key end

     0   :  { %s1500_s0 = inlined_call_operand.vmem [shape: f32[2,8,32], index: 0, kind: input, shape index: {}]   ;;  %s1501_s1 = inlined_call_operand.vmem [shape: f32[2,8], index: 1, kind: input, shape index: {}]   ;;  %s1502_s2 = inlined_call_operand.vmem [shape: bf16[4,32,24], index: 2, kind: input, shape index: {}]   ;;  %s1503_s3 = inlined_call_operand.vmem [shape: bf16[4,8,32], index: 3, kind: input, shape index: {}]   ;;  %s1504_s4 = inlined_call_operand.vmem [shape: f32[1,32], index: 4, kind: input, shape index: {}]   ;;  %s1505_s5 = inlined_call_operand.<no memory space> [shape: f32[1], index: 5, kind: input, shape index: {}]   ;;  %s1506_s6 = inlined_call_operand.hbm [shape: f32[2,8,32], index: 6, kind: output, shape index: {0}]   ;;  %s1507_s7 = inlined_call_operand.hbm [shape: f32[2,4,8,8], index: 7, kind: output, shape index: {1}]  }
   0x1   :  { %1508 = sst [smem:[#allocation11_spill]] %s1500_s0 }
   0x2   :  { %13 = sst [smem:[#allocation4]] %s1505_s5 }
   0x3   :  { %14 = vsyncpa [#allocation6], 0 }
   0x4   :  { %15 = vsyncpa [#allocation8], 0 }
   0x5   :  { %17 = vsyncpa [#allocation8 + $0x1], 0  ;;  %s1279_s26 = smov 0   ;;  %s1281_s27 = smov 0  }
   0x6   :  { %s1283_s28 = smov 0   ;;  %s1285_s29 = smov 0  }
   0x7   :  { %s1287_s30 = smov 0   ;;  %s1289_s8 = smov 0  }
   0x8 LB: > { %s954_s5 = sadd.s32 4294967295, %s1223_s8   ;;  %s955_s9 = sadd.s32 4294967294, %s1223_s8   ;;  %s1223_s8 = sphi %s1289_s8, %s23_s8   ;;  %s1219_s30 = sphi %s1287_s30, %s1517_s30   ;;  %s1215_s29 = sphi %s1285_s29, %s1516_s29   ;;  %s1211_s28 = sphi %s1283_s28, %s1515_s28   ;;  %s1207_s27 = sphi %s1281_s27, %s1514_s27   ;;  %s1203_s26 = sphi %s1279_s26, %s1513_s26  }
   0x9   : > { %s32_s10 = sadd.s32 1, %s1219_s30  ;;  %s216_s11 = sadd.s32 1, %s1211_s28 }
   0xa   : > { %p33_p0 = scmp.ge.s32.totalorder %s32_s10, 4  ;;  %p226_p1 = scmp.ne.s32.totalorder %s1211_s28, %s1207_s27 }
   0xb   : > { %p1315_p2 = scmp.eq.s32.totalorder %s954_s5, 3  ;;  %p232_p3 = scmp.ne.s32.totalorder %s1207_s27, %s1203_s26 }
   0xc   : > { %s1519_s10 = smov (%p33_p0, %s32_s10), 0  ;;  %p233_p5 = scmp.eq.s32.totalorder %s955_s9, 3 }
   0xd   : > { %p1325_p4 = por %p1315_p2, %p226_p1  ;;  %s212_s14 = ssub.s32 %s1219_s30, %s1519_s10 }
   0xe   : > { %p960_p6 = scmp.ge.s32.totalorder %s1223_s8, 1  ;;  %p214_p7 = scmp.eq.s32.totalorder %s212_s14, 0 }
   0xf   : > { %p1332_p8 = por %p233_p5, %p232_p3  ;;  %p288_p9 = scmp.lt.s32.totalorder %s1223_s8, 5 }
  0x10   : > { %s1338_s16 = scalar_select %p214_p7, %s1211_s28, %s216_s11  }
  0x11   : > { %p289_p10 = pnand %p960_p6, %p288_p9 }
  0x12   : > { %s330_s17 = sand.u32 (!%p289_p10), 1, %s1207_s27   ;;  %p343_p11 = scmp.lt.s32.totalorder (!%p289_p10), %s1215_s29, 3 }
  0x13   : > { %292 = sbr.rel (%p289_p10) target bundleno = 1532 (0x5fc), region = 44  ;;  %s961_s18 = sshll.u32 (!%p289_p10), %s330_s17, 4 }
  0x14   : > { %s1355_s11 = scalar_lea.vmem (!%p289_p10), [#allocation7], %s961_s18  ;;  %p965_p12 = scmp.ne.s32.totalorder (!%p289_p10), %s1215_s29, 0 }
  0x1a   : > { %s344_s19 = scalar_select %p343_p11, %s1215_s29, 3 }
  0x1b   : > { %358 = sbr.rel (%p965_p12) target bundleno = 157 (0x9d), region = 48  ;;  %v360_v0 = vlaneseq (!%p965_p12)  ;;  %vm412_vm0 = vcmask (!%p965_p12), 261120   ;;  %v1225_v1 = vmov (!%p965_p12), 1966171168   ;;  %v1226_v4 = vmov (!%p965_p12), 0.0  }
  0x1c   : > { %s982_s20 = sshll.u32 %s344_s19, 4  ;;  %s964_s21 = sshll.u32 %s344_s19, 2  ;;  %v376_v2 = vunpack.c.l.s4 (!%p965_p12), %v1225_v1  ;;  %413 = vst.msk [vmem:[#allocation3] sm:$0xff] (!%p965_p12), %vm412_vm0, %v1226_v4  ;;  %414 = vst.msk [vmem:[#allocation3 + $0x8] sm:$0xff] (!%p965_p12), %vm412_vm0, %v1226_v4  ;;  %v359_v5 = vld [vmem:[%s1501_s1] sm:$0x3] (!%p965_p12) }
  0x1d   : > { %s1348_s24 = scalar_lea.vmem %s1502_s2, %s982_s20  ;;  %s1353_s9 = scalar_lea.vmem %s1503_s3, %s964_s21  ;;  %v361_v3 = vshrl.u32 (!%p965_p12), %v360_v0, 7  ;;  %vm409_vm1 = vcmask (!%p965_p12), 64512  }
  0x1e   : > { %v377_v6 = vunpack.c.0.s8 (!%p965_p12), %v376_v2 }
  0x1f   : > { %v362_v7 = vsub.s32 (!%p965_p12), 0, %v361_v3  ;;  %v369_v8 = vsub.s32 (!%p965_p12), 1, %v361_v3 }
  0x20   : > { %v380_v9 = vsub.s32 (!%p965_p12), %v377_v6, %v361_v3 }
  0x21   : > { %v363_v10 = vrot.slane (!%p965_p12), %v359_v5, %v362_v7  ;;  %v370_v12 = vrot.slane (!%p965_p12), %v359_v5, %v369_v8 }
  0x22   : > { %v381_v11 = vrot.slane %v359_v5, %v380_v9 }
  0x23   : > { %365 = vbcast.lane.b32.xlu0 %v363_v10, 256 }
  0x24   : > { %v389_v13 = vrot.slane %v381_v11, %v380_v9  ;;  %v382_v14 = vcombine.high %v381_v11, %v381_v11 }
  0x26   : > { %v400_v15 = vrot.slane %v389_v13, %v362_v7  ;;  %v396_v16 = vrot.slane %v382_v14, %v380_v9 }
  0x27   : > { %372 = vbcast.lane.b32.xlu0 %v370_v12, 256 }
  0x28   : > { %v404_v17 = vrot.slane %v396_v16, %v362_v7 }
  0x95   : > { %v366_v18 = vpop.permute.xlu0 %365 }
  0x96   : > { %v407_v19 = vmul.f32 %v400_v15, %v366_v18 }
  0x98   : > { %410 = vst.msk [vmem:[#allocation2] sm:$0xff] %vm409_vm1, %v407_v19 }
  0x99   : > { %v373_v20 = vpop.permute.xlu0 %372 }
  0x9a   : > { %v408_v21 = vmul.f32 %v404_v17, %v373_v20 }
  0x9c   : > { %411 = vst.msk [vmem:[#allocation2 + $0x8] sm:$0xff] %vm409_vm1, %v408_v21 }
  0x9d PF: > { %v1105_v22 = vld [vmem:[%s1348_s24] sm:$0xff]   ;;  %v1227_v23 = vmov 0.0   ;;  %v1106_v24 = vld [vmem:[%s1348_s24 + $0x8] sm:$0xff]   ;;  %vm1228_vm2 = vmmov 0   ;;  %s1512_s0 = sld [smem:[#allocation11_spill]]  ;;  %vm434_vm3 = vcmask 261120  }
  0x9e   : > { %996 = vmatprep.subr.bf16.mxu0 %v1227_v23  ;;  %1004 = vmatprep.subr.bf16.mxu1 %v1227_v23  ;;  %s1229_s23 = smov 120   ;;  %s479_s24 = sld [smem:[#allocation4]]  ;;  %vm490_vm4 = vcmask 64512   ;;  %vm629_vm7 = vcmask 1043456   ;;  %v724_v19 = vld [vmem:[%s1353_s9] sm:$0xf] }
  0x9f   : > { %997 = vmatpush3.bf16.msra.mxu0 %v1105_v22  ;;  %1000 = vmatprep.mubr.msk.bf16.mxu0 %vm1228_vm2, %v1227_v23  ;;  %v586_v43 = vld [vmem:[#allocation2] sm:$0xff]  ;;  %s1230_s25 = smov 112   ;;  %v729_v20 = vsel %vm629_vm7, %v724_v19, 0  ;;  %p974_p13 = scmp.ne.s32.totalorder %s1215_s29, 3 }
  0xa0   : > { %998 = vmatprep.subr.bf16.mxu0 %v1227_v23  ;;  %1006 = vmatprep.mubr.msk.bf16.mxu1 %vm1228_vm2, %v1227_v23  ;;  %vm588_vm5 = vcmp.gt.f32.partialorder %v586_v43, 0.0 }
  0xa3   : > { %v415_v25 = vld [vmem:[%s1512_s0] sm:$0xff]  ;;  %v416_v26 = vld [vmem:[%s1512_s0 + $0x8] sm:$0xff]  ;;  %999 = vmatpush3.bf16.msra.mxu0 %v1106_v24 }
  0xa4   : > { %v417_v27 = vpack.c.bf16 %v416_v26, %v415_v25  ;;  %1010 = vmatprep.subr.bf16.mxu0 %v1227_v23  ;;  %v480_v34 = vstv %s479_s24  ;;  %v587_v44 = vld [vmem:[#allocation2 + $0x8] sm:$0xff] }
  0xa5   : > { %vm589_vm6 = vcmp.gt.f32.partialorder %v587_v44, 0.0 }
  0xa6   : > { %1001 = vmatmul.mubr.msk.bf16.vlgmr.msra.gmra.mrb[0].mxu0 %vm434_vm3, %v417_v27 }
  0xa7   : > { %1012 = vmatprep.mubr.msk.bf16.mxu0 %vm1228_vm2, %v1227_v23 }
 0x179   : > { %v472_v28 = vpop.f32.mrb[0].mxu0 }
 0x17a   : > { %v1002_v29 = vpop.f32.mrb[1].mxu0  ;;  %v485_v30 = vpack.c.bf16 %v472_v28, %v472_v28  ;;  %v481_v37 = vmul.f32 %v480_v34, %v472_v28 }
 0x17b   : > { %v475_v31 = vpop.f32.mrb[2].mxu0 }
 0x17c   : > { %488 = vrot.lane.b32.xlu0 %v485_v30, %s1229_s23  ;;  %v1003_v32 = vpop.f32.mrb[3].mxu0  ;;  %v486_v33 = vpack.c.bf16 %v475_v31, %v475_v31  ;;  %v483_v40 = vpack.c.bf16 %v481_v37, %v481_v37  ;;  %v482_v41 = vmul.f32 %v480_v34, %v475_v31 }
 0x17d   : > { %v722_v32 = vld [vmem:[#allocation3 + $0x8] sm:$0xff] }
 0x17e   : > { %v484_v42 = vpack.c.bf16 %v482_v41, %v482_v41 }
 0x180   : > { %538 = vrot.lane.b32.xlu0 %v486_v33, %s1229_s23 }
 0x1ee   : > { %v489_v35 = vpop.permute.xlu0 %488 }
 0x1ef   : > { %v495_v36 = vsel %vm490_vm4, %v489_v35, 0 }
 0x1f0   : > { %1005 = vmatpush3.bf16.xpose.msra.mxu1 %v495_v36 }
 0x1f1   : > { %1016 = vmatprep.subr.bf16.mxu1 %v1227_v23 }
 0x1f2   : > { %v539_v38 = vpop.permute.xlu0 %538 }
 0x1f3   : > { %v544_v39 = vsel %vm490_vm4, %v539_v38, 0 }
 0x1f4   : > { %1011 = vmatpush3.bf16.xpose.msra.mxu0 %v544_v39  ;;  %v975_v39 = vld [vmem:[%s1504_s4] ss:$0 sm:$0xff] (!%p974_p13) }
 0x1f5   : > { %1022 = vmatprep.subr.bf16.mxu0 %v1227_v23 }
 0x1f7   : > { %1007 = vmatmul.mubr.msk.bf16.vlgmr.msra.gmra.mrb[0].mxu1 %vm490_vm4, %v483_v40 }
 0x1f8   : > { %1018 = vmatprep.mubr.msk.bf16.mxu1 %vm1228_vm2, %v1227_v23 }
 0x1fb   : > { %1013 = vmatmul.mubr.msk.bf16.vlgmr.msra.gmra.mrb[4].mxu0 %vm490_vm4, %v484_v42 }
 0x1fc   : > { %1024 = vmatprep.mubr.msk.bf16.mxu0 %vm1228_vm2, %v1227_v23 }
 0x2ca   : > { %v531_v45 = vpop.f32.mrb[0].mxu1 }
 0x2cb   : > { %v590_v46 = vsel %vm588_vm5, %v531_v45, -1e+30  ;;  %v1008_v47 = vpop.f32.mrb[1].mxu1 }
 0x2cc   : > { %v534_v48 = vpop.f32.mrb[2].mxu1  ;;  %v592_v49 = vsel %vm490_vm4, %v590_v46, -inf }
 0x2cd   : > { %593 = vmax.xlane.f32.xlu1 %v592_v49  ;;  %v1009_v50 = vpop.f32.mrb[3].mxu1 }
 0x2ce   : > { %v580_v51 = vpop.f32.mrb[4].mxu0 }
 0x2cf   : > { %v591_v52 = vsel %vm589_vm6, %v580_v51, -1e+30  ;;  %v1014_v53 = vpop.f32.mrb[5].mxu0 }
 0x2d0   : > { %v583_v54 = vpop.f32.mrb[6].mxu0  ;;  %v595_v55 = vsel %vm490_vm4, %v591_v52, -inf }
 0x2d1   : > { %596 = vmax.xlane.f32.xlu1 %v595_v55  ;;  %v1015_v56 = vpop.f32.mrb[7].mxu0 }
 0x2e2   : > { %624 = vrot.lane.b32.xlu1 %v485_v30, %s1230_s25 }
 0x35a   : > { %v594_v57 = vpop.xlane.xlu1 %593 }
 0x35b   : > { %v598_v58 = vsub.f32 %v590_v46, %v594_v57 }
 0x35d   : > { %v600_v59 = vmul.f32 1.442695, %v598_v58 }
 0x35e   : > { %v597_v60 = vpop.xlane.xlu1 %596 }
 0x35f   : > { %1107 = vpow2.f32 %v600_v59  ;;  %v599_v61 = vsub.f32 %v591_v52, %v597_v60 }
 0x361   : > { %v602_v62 = vmul.f32 1.442695, %v599_v61 }
 0x362   : > { %v625_v63 = vpop.permute.xlu1 %624 }
 0x363   : > { %1109 = vpow2.f32 %v602_v62  ;;  %v631_v0 = vsel %vm629_vm7, %v625_v63, 0 }
 0x364   : > { %1017 = vmatpush3.bf16.msra.mxu1 %v631_v0 }
 0x365   : > { %1028 = vmatprep.subr.bf16.mxu1 %v1227_v23 }
 0x369   : > { %v1108_v1 = vpop.eup %1107 }
 0x36a   : > { %v604_v2 = vmul.f32 %v1108_v1, %v586_v43 }
 0x36c   : > { %v606_v3 = vsel %vm490_vm4, %v604_v2, 0.0 }
 0x36d   : > { %v1110_v4 = vpop.eup %1109  ;;  %607 = vadd.xlane.f32.xlu0 %v606_v3 }
 0x36e   : > { %v605_v5 = vmul.f32 %v1110_v4, %v587_v44 }
 0x370   : > { %v609_v6 = vsel %vm490_vm4, %v605_v5, 0.0 }
 0x371   : > { %610 = vadd.xlane.f32.xlu1 %v609_v6 }
 0x382   : > { %673 = vrot.lane.b32.xlu1 %v486_v33, %s1230_s25 }
 0x3fa   : > { %v608_v7 = vpop.xlane.xlu0 %607 }
 0x3fb   : > { %vm612_vm8 = vcmp.eq.f32.partialorder %v608_v7, 0.0 }
 0x3fc   : > { %v614_v8 = vsel %vm612_vm8, 1.0, %v608_v7 }
 0x3fd   : > { %1111 = vrcp.f32 %v614_v8 }
 0x3fe   : > { %v611_v9 = vpop.xlane.xlu1 %610 }
 0x3ff   : > { %vm613_vm9 = vcmp.eq.f32.partialorder %v611_v9, 0.0 }
 0x400   : > { %v615_v10 = vsel %vm613_vm9, 1.0, %v611_v9 }
 0x401   : > { %1113 = vrcp.f32 %v615_v10 }
 0x402   : > { %v674_v11 = vpop.permute.xlu1 %673 }
 0x403   : > { %v679_v12 = vsel %vm629_vm7, %v674_v11, 0 }
 0x404   : > { %1023 = vmatpush3.bf16.msra.mxu0 %v679_v12 }
 0x407   : > { %v1112_v13 = vpop.eup %1111 }
 0x408   : > { %v618_v14 = vmul.f32 %v1112_v13, %v604_v2 }
 0x40a   : > { %620 = vst.msk [vmem:[%s1355_s11] sm:$0xff] %vm490_vm4, %v618_v14  ;;  %v622_v15 = vpack.c.bf16 %v618_v14, %v618_v14 }
 0x40b   : > { %v1114_v16 = vpop.eup %1113 }
 0x40c   : > { %v619_v17 = vmul.f32 %v1114_v16, %v605_v5  ;;  %1019 = vmatmul.mubr.msk.bf16.vlgmr.msra.gmra.mrb[4].mxu1 %vm490_vm4, %v622_v15 }
 0x40d   : > { %1030 = vmatprep.mubr.msk.bf16.mxu1 %vm1228_vm2, %v1227_v23  ;;  %1029 = vmatpush3.bf16.msra.mxu1 %v729_v20  ;;  %v721_v23 = vld [vmem:[#allocation3] sm:$0xff] }
 0x40e   : > { %621 = vst.msk [vmem:[%s1355_s11 + $0x8] sm:$0xff] %vm490_vm4, %v619_v17  ;;  %v623_v18 = vpack.c.bf16 %v619_v17, %v619_v17 }
 0x410   : > { %1025 = vmatmul.mubr.msk.bf16.vlgmr.msra.gmra.mrb[8].mxu0 %vm490_vm4, %v623_v18 }
 0x4df   : > { %v667_v21 = vpop.f32.mrb[4].mxu1 }
 0x4e0   : > { %v1020_v22 = vpop.f32.mrb[5].mxu1 }
 0x4e1   : > { %v670_v24 = vpop.f32.mrb[6].mxu1 }
 0x4e2   : > { %v1021_v25 = vpop.f32.mrb[7].mxu1 }
 0x4e3   : > { %v715_v26 = vpop.f32.mrb[8].mxu0 }
 0x4e4   : > { %v723_v27 = vpack.c.bf16 %v715_v26, %v667_v21  ;;  %v1026_v28 = vpop.f32.mrb[9].mxu0 }
 0x4e5   : > { %v718_v29 = vpop.f32.mrb[10].mxu0 }
 0x4e6   : > { %v1027_v30 = vpop.f32.mrb[11].mxu0  ;;  %1031 = vmatmul.mubr.msk.bf16.vlgmr.msra.gmra.mrb[8].mxu1 %vm490_vm4, %v723_v27 }
 0x5b8   : > { %779 = sbr.rel (%p974_p13) target bundleno = 1481 (0x5c9), region = 52 }
 0x5b9   : > { %v765_v31 = vpop.f32.mrb[8].mxu1 }
 0x5ba   : > { %v772_v33 = vadd.f32 %v765_v31, %v721_v23  ;;  %v1032_v34 = vpop.f32.mrb[9].mxu1 }
 0x5bb   : > { %v768_v35 = vpop.f32.mrb[10].mxu1 }
 0x5bc   : > { %774 = vst.msk [vmem:[#allocation3] sm:$0xff] %vm434_vm3, %v772_v33  ;;  %v773_v36 = vadd.f32 %v768_v35, %v722_v32  ;;  %v1033_v37 = vpop.f32.mrb[11].mxu1 }
 0x5be   : > { %775 = vst.msk [vmem:[#allocation3 + $0x8] sm:$0xff] %vm434_vm3, %v773_v36 }
 0x5c3   : > { %v780_v38 = vld [vmem:[#allocation3] sm:$0xff] }
 0x5c4   : > { %v789_v41 = vadd.f32 %v975_v39, %v780_v38 }
 0x5c5   : > { %v781_v40 = vld [vmem:[#allocation3 + $0x8] sm:$0xff] }
 0x5c6   : > { %v790_v42 = vadd.f32 %v975_v39, %v781_v40  ;;  %791 = vst.msk [vmem:[#allocation5] sm:$0xff] %vm434_vm3, %v789_v41 }
 0x5c8   : > { %792 = vst.msk [vmem:[#allocation5 + $0x8] sm:$0xff] %vm434_vm3, %v790_v42 }
 0x5c9 PF: > { %s1231_s14 = smov [#allocation5]  }
 0x5ca   : > { %s807_s19 = sshll.u32 %s1231_s14, 4  ;;  %s808_s19 = int_to_ptr.vmem [resolvable:$true] %s807_s19 }
 0x5cb   : > { %s1115_s18 = scalar_lea.vmem %s808_s19, 256  ;;  %p1122_p5 = scmp.lt.s32.totalorder %s808_s19, %s808_s19 }
 0x5cc   : > { %p1116_p0 = scmp.ne.s32.totalorder %s808_s19, %s1115_s18  ;;  %p1123_p6 = scmp.lt.s32.totalorder %s1115_s18, %s1115_s18 }
 0x5ce   : > { %p1117_p1 = pnand %p1116_p0, %p1315_p2  ;;  %p1124_p7 = por %p1123_p6, %p1122_p5 }
 0x5d0   : > { %p1118_p3 = pneg %p1117_p1 }
 0x5d2   : > { %p1125_p9 = pnand %p1124_p7, %p1118_p3 }
 0x5d4   : > { %1128 = shalt.err (!%p1125_p9)
}
 0x5d5   : > { %s1129_s22 = scalar_lea.hbm %s1506_s6, 256 }
 0x5d6   : > { %p1130_p10 = scmp.ne.s32.totalorder %s1506_s6, %s1129_s22  ;;  %p1135_p13 = scmp.lt.u32.totalorder %s1129_s22, %s1506_s6 }
 0x5d8   : > { %p1131_p11 = pnand %p1130_p10, %p1315_p2 }
 0x5da   : > { %p1132_p12 = pneg %p1131_p11 }
 0x5dc   : > { %p1137_p0 = pnand %p1135_p13, %p1132_p12 }
 0x5de   : > { %1140 = shalt.err (!%p1137_p0)
}
 0x5df   : > { %s1232_s9 = smov 128   ;;  %s1233_s14 = smov 8  }
 0x5e0   : > { %1035 = dma.vmem_to_hbm [thread:$0]  (%p1315_p2), %s808_s19, 256, %s1506_s6, [#allocation6], %s1232_s9, %s1232_s9, %s1233_s14  }
 0x5e1   : > { %s978_s21 = sshll.u32 %s1215_s29, 7  ;;  %s825_s25 = sshll.u32 %s1355_s11, 4  ;;  %s1444_s25 = int_to_ptr.vmem [resolvable:$true] %s825_s25 }
 0x5e2   : > { %s1441_s24 = scalar_lea.hbm %s1507_s7, %s978_s21  ;;  %s1448_s5 = scalar_lea.sflag [#allocation8], %s330_s17 }
 0x5e3   : > { %s1141_s0 = scalar_lea.vmem %s1444_s25, 256  ;;  %s1234_s29 = smov [#allocation7]  }
 0x5e4   : > { %p1142_p1 = scmp.ne.s32.totalorder %s1444_s25, %s1141_s0  ;;  %s1145_s19 = sshll.u32 %s1234_s29, 4  ;;  %s1146_s19 = int_to_ptr.vmem [resolvable:$false] %s1145_s19 }
 0x5e5   : > { %s1147_s18 = scalar_lea.vmem %s1146_s19, 512  ;;  %p1148_p6 = scmp.lt.s32.totalorder %s1444_s25, %s1146_s19 }
 0x5e6   : > { %p1143_p3 = pnand %p1142_p1, %p1325_p4  ;;  %p1149_p7 = scmp.lt.s32.totalorder %s1147_s18, %s1141_s0 }
 0x5e8   : > { %p1144_p5 = pneg %p1143_p3  ;;  %p1150_p9 = por %p1149_p7, %p1148_p6 }
 0x5ea   : > { %p1151_p10 = pnand %p1150_p9, %p1144_p5 }
 0x5ec   : > { %1154 = shalt.err (!%p1151_p10)
}
 0x5ed   : > { %s1155_s17 = scalar_lea.hbm %s1441_s24, 256  ;;  %s1159_s21 = scalar_lea.hbm %s1507_s7, 1024 }
 0x5ee   : > { %p1156_p11 = scmp.ne.s32.totalorder %s1441_s24, %s1155_s17  ;;  %p1160_p0 = scmp.lt.u32.totalorder %s1441_s24, %s1507_s7 }
 0x5ef   : > { %p1161_p1 = scmp.lt.u32.totalorder %s1159_s21, %s1155_s17  ;;  %p1163_p5 = scmp.lt.u32.totalorder %s1155_s17, %s1441_s24 }
 0x5f0   : > { %p1157_p12 = pnand %p1156_p11, %p1325_p4 }
 0x5f1   : > { %p1162_p3 = por %p1161_p1, %p1160_p0 }
 0x5f2   : > { %p1158_p13 = pneg %p1157_p12 }
 0x5f3   : > { %p1164_p6 = por %p1163_p5, %p1162_p3 }
 0x5f5   : > { %p1165_p7 = pnand %p1164_p6, %p1158_p13 }
 0x5f7   : > { %1168 = shalt.err (!%p1165_p7)
}
 0x5f8   : > { %s1235_s0 = smov 512  }
 0x5f9   : > { %1036 = dma.vmem_to_hbm [thread:$0]  (%p1325_p4), %s1444_s25, 256, %s1441_s24, %s1448_s5, %s1232_s9, %s1235_s0, %s1233_s14  }
 0x5fa   : > { %1194 = dma.done.wait (%p1315_p2), [#allocation6], 256  }
 0x5fb   : > { %1196 = vsyncadd (%p1315_p2), [#allocation6], 4294967040 }
 0x5fc PF: > { %p1046_p9 = scmp.ge.s32.totalorder %s1223_s8, 2  ;;  %s844_s29 = sand.u32 1, %s1203_s26  }
 0x5fd   : > { %s845_s13 = scalar_lea.sflag [#allocation8], %s844_s29 }
 0x5fe   : > { %p1041_p10 = pnand %p1046_p9, %p1332_p8 }
 0x600   : > { %1198 = dma.done.wait (!%p1041_p10), %s845_s13, 256  }
 0x601   : > { %1200 = vsyncadd (!%p1041_p10), %s845_s13, 4294967040  ;;  %s23_s8 = sadd.s32 1, %s1223_s8   ;;  %s1513_s26 = smov %s1207_s27 }
 0x602   : > { %p20_p11 = scmp.ge.s32.totalorder %s23_s8, 6   ;;  %s1514_s27 = smov %s1211_s28 }
 0x603   : > { %s1515_s28 = smov %s1338_s16  ;;  %s1516_s29 = smov %s1219_s30 }
 0x604   : > { %s1517_s30 = smov %s1519_s10  ;;  %22 = sbr.rel (!%p20_p11) target bundleno = 8 (0x8), region = 106 }
 0x60b   :  { %850 = vsyncpa [#allocation6], 1 }
 0x60c   :  { %852 = vsyncpa [#allocation6 + $0x1], 1 }
 0x60d   :  { %853 = vsyncpa [#allocation8], 1 }
 0x60e   :  { %855 = vsyncpa [#allocation8 + $0x1], 1 }

</bundles_post_ra>
